<compile_context>
chip_gen: v6e
topology: v6e:2x2x1
jax: 0.10.0
libtpu: 0.0.40
codegen_flags: <defaults>
</compile_context>

<pallas_src>
import functools

import jax
import jax.numpy as jnp
import numpy as np
from jax.experimental import pallas as pl
from jax.experimental.pallas import tpu as pltpu


# ----------------------------------------------------------------------------
# Pallas kernel: encoder + fused policy/value head + categorical normalization
# ----------------------------------------------------------------------------
def policy_kernel(x_ref, wenc_ref, benc_ref, whead_ref, bhead_ref, out_ref,
                  *, num_actions):
    # encoder: feat = relu(x @ W_enc + b_enc)         [BM, F_pad]  (bf16 MXU, f32 acc)
    feat = jnp.dot(x_ref[...], wenc_ref[...],
                   preferred_element_type=jnp.float32) + benc_ref[...]
    feat = jnp.maximum(feat, 0.0)

    # fused heads: [BM, 128] — lanes 0:A = logits, lane A = value, rest zero-pad
    heads = jnp.dot(feat, whead_ref[...],
                    preferred_element_type=jnp.float32) + bhead_ref[...]
    hp = heads.shape[-1]

    # Categorical(logits): log-probs over the first `num_actions` lanes only.
    lane = jax.lax.broadcasted_iota(jnp.int32, heads.shape, dimension=1)
    masked = jnp.where(lane < num_actions, heads, -jnp.inf)
    m = jnp.max(masked, axis=-1, keepdims=True)
    lse = m + jnp.log(jnp.sum(jnp.exp(masked - m), axis=-1, keepdims=True))

    # lane-dense stores: two full 128-lane slabs into one [BM, 256] output.
    out_ref[:, :hp] = heads
    out_ref[:, hp:] = masked - lse


def policy_forward(x, params, *, num_actions):
    """x: [B, C, H, W] float32 (NCHW).  Returns (logits, log_probs, value)."""
    B = x.shape[0]
    x_flat = x.reshape(B, -1)                      # [B, C*H*W]
    d_in = x_flat.shape[1]

    w_enc, b_enc, w_heads, b_heads = params
    F = w_enc.shape[1]                             # padded feature dim (128)
    HP = w_heads.shape[1]                          # padded head width   (128)

    # Pad batch to a sublane-friendly block; block the batch when it is large
    # so the grid axis can shard across TensorCores (v7x megacore).
    BM = 128 if B >= 128 else ((B + 7) // 8) * 8
    B_pad = ((B + BM - 1) // BM) * BM
    if B_pad != B:
        x_flat = jnp.pad(x_flat, ((0, B_pad - B), (0, 0)))
    x_bf16 = x_flat.astype(jnp.bfloat16)
    nb = B_pad // BM

    kern = functools.partial(policy_kernel, num_actions=num_actions)
    out = pl.pallas_call(
        kern,
        out_shape=jax.ShapeDtypeStruct((B_pad, 2 * HP), jnp.float32),
        grid=(nb,),
        in_specs=[
            pl.BlockSpec((BM, d_in), lambda i: (i, 0)),   # x block
            pl.BlockSpec((d_in, F), lambda i: (0, 0)),    # encoder weight (bf16)
            pl.BlockSpec((1, F), lambda i: (0, 0)),       # encoder bias
            pl.BlockSpec((F, HP), lambda i: (0, 0)),      # fused head weight
            pl.BlockSpec((1, HP), lambda i: (0, 0)),      # fused head bias
        ],
        out_specs=pl.BlockSpec((BM, 2 * HP), lambda i: (i, 0)),
        compiler_params=pltpu.CompilerParams(
            dimension_semantics=("parallel",)),
    )(x_bf16, w_enc, b_enc, w_heads, b_heads)

    logits = out[:B, :num_actions]
    log_probs = out[:B, HP:HP + num_actions]
    value = out[:B, num_actions]                  # value head fused into lane A
    return logits, log_probs, value


# ----------------------------------------------------------------------------
# Deterministic parameter init (mirrors orthogonal_init on the two heads)
# ----------------------------------------------------------------------------
def orthogonal(rng, out_dim, in_dim, gain):
    # matches torch.nn.init.orthogonal_ semantics (QR + sign fix + gain)
    a = rng.standard_normal((out_dim, in_dim)).astype(np.float64)
    flat = a if out_dim <= in_dim else a.T
    q, r = np.linalg.qr(flat.T)
    q = q * np.sign(np.diag(r))
    q = q.T if out_dim <= in_dim else q
    if q.shape != (out_dim, in_dim):
        q = q.T
    return (gain * q).astype(np.float32)


def make_params(d_in, feature_dim, num_actions, f_pad=128, head_pad=128):
    rng = np.random.default_rng(0)
    # encoder Linear(d_in, feature_dim), simple scaled-normal init
    w_enc = (rng.standard_normal((d_in, feature_dim)) / np.sqrt(d_in)
             ).astype(np.float32)                               # [D, F]
    # policy head: orthogonal, gain=0.01 ; stored transposed [F, A]
    w_pol = orthogonal(rng, num_actions, feature_dim, 0.01).T
    # value head: orthogonal, gain=1.0 ; stored transposed [F, 1]
    w_val = orthogonal(rng, 1, feature_dim, 1.0).T

    # --- pad feature dim F -> f_pad, fuse + pad heads (A+1) -> head_pad -----
    w_enc_p = np.zeros((d_in, f_pad), np.float32)
    w_enc_p[:, :feature_dim] = w_enc
    b_enc_p = np.zeros((1, f_pad), np.float32)

    w_heads = np.zeros((f_pad, head_pad), np.float32)
    w_heads[:feature_dim, :num_actions] = w_pol
    w_heads[:feature_dim, num_actions:num_actions + 1] = w_val
    b_heads = np.zeros((1, head_pad), np.float32)   # both biases init to zero

    return (jnp.asarray(w_enc_p, dtype=jnp.bfloat16),   # bf16: halves weight DMA
            jnp.asarray(b_enc_p),
            jnp.asarray(w_heads),                        # small, kept f32
            jnp.asarray(b_heads))


# ----------------------------------------------------------------------------
if __name__ == "__main__":
    B, C, H, W = 2, 4, 16, 16
    feature_dim, num_actions = 32, 5

    key = jax.random.PRNGKey(0)
    x = jax.random.normal(key, (B, C, H, W), dtype=jnp.float32)

    params = make_params(C * H * W, feature_dim, num_actions)

    fwd = jax.jit(functools.partial(policy_forward, params=params,
                                    num_actions=num_actions))
    logits, log_probs, value = fwd(x)
    jax.block_until_ready((logits, log_probs, value))

    # ---------------- reference (numpy f32, same bf16-rounded inputs) -------
    x_flat = np.asarray(x).reshape(B, -1)
    x_bf = np.asarray(jnp.asarray(x_flat).astype(jnp.bfloat16)).astype(np.float32)
    w_enc = np.asarray(params[0]).astype(np.float32)
    b_enc = np.asarray(params[1])
    w_heads = np.asarray(params[2])
    b_heads = np.asarray(params[3])

    feat = np.maximum(x_bf @ w_enc + b_enc, 0.0)
    heads = feat @ w_heads + b_heads
    ref_logits = heads[:, :num_actions]
    ref_val = heads[:, num_actions]
    m = ref_logits.max(axis=-1, keepdims=True)
    ref_lse = m + np.log(np.exp(ref_logits - m).sum(axis=-1, keepdims=True))
    ref_logp = ref_logits - ref_lse

    assert logits.shape == (B, num_actions)
    assert log_probs.shape == (B, num_actions)
    assert value.shape == (B,)
    np.testing.assert_allclose(np.asarray(logits), ref_logits,
                               rtol=1e-3, atol=1e-3)
    np.testing.assert_allclose(np.asarray(log_probs), ref_logp,
                               rtol=1e-3, atol=1e-3)
    np.testing.assert_allclose(np.asarray(value), ref_val,
                               rtol=1e-3, atol=1e-3)

    # TODO(synk): dist.sample() (stochastic action draw) lives in `act`, not
    # forward(); the Categorical distribution is returned as normalized
    # log-probs instead of a sampler.
    print("KERNEL_OK")
</pallas_src>

<mosaic_0001>
module attributes {stable_mosaic.version = 11 : i64} {
  func.func @policy_kernel(%arg0: i32, %arg1: memref<8x1024xbf16, #tpu.memory_space<vmem>>, %arg2: memref<1024x128xbf16, #tpu.memory_space<vmem>>, %arg3: memref<1x128xf32, #tpu.memory_space<vmem>>, %arg4: memref<128x128xf32, #tpu.memory_space<vmem>>, %arg5: memref<1x128xf32, #tpu.memory_space<vmem>>, %arg6: memref<8x256xf32, #tpu.memory_space<vmem>>) attributes {dimension_semantics = [#tpu.dimension_semantics<parallel>], iteration_bounds = array<i64: 1>, scalar_prefetch = 0 : i64, scratch_operands = 0 : i64, tpu.core_type = #tpu.core_type<tc>, window_params = [{transform_indices = @transform_0, window_bounds = array<i64: 8, 1024>}, {pipeline_mode = #tpu.pipeline_mode<synchronous>, transform_indices = @transform_1, window_bounds = array<i64: 1024, 128>}, {pipeline_mode = #tpu.pipeline_mode<synchronous>, transform_indices = @transform_2, window_bounds = array<i64: 1, 128>}, {pipeline_mode = #tpu.pipeline_mode<synchronous>, transform_indices = @transform_3, window_bounds = array<i64: 128, 128>}, {pipeline_mode = #tpu.pipeline_mode<synchronous>, transform_indices = @transform_4, window_bounds = array<i64: 1, 128>}, {transform_indices = @transform_5, window_bounds = array<i64: 8, 256>}]} {
    %c0 = arith.constant 0 : index
    %c0_0 = arith.constant 0 : index
    %0 = vector.load %arg1[%c0, %c0_0] : memref<8x1024xbf16, #tpu.memory_space<vmem>>, vector<8x1024xbf16>
    %c0_1 = arith.constant 0 : index
    %c0_2 = arith.constant 0 : index
    %1 = vector.load %arg2[%c0_1, %c0_2] : memref<1024x128xbf16, #tpu.memory_space<vmem>>, vector<1024x128xbf16>
    %cst = arith.constant dense<0.000000e+00> : vector<8x128xf32>
    %2 = tpu.matmul %0, %1, %cst {dimension_numbers = #tpu.dot_dimension_numbers<[1], [0], [0], [1], [0, 0, 1, 1], [], []>} : vector<8x1024xbf16>, vector<1024x128xbf16>, vector<8x128xf32> -> vector<8x128xf32>
    %c0_3 = arith.constant 0 : index
    %c0_4 = arith.constant 0 : index
    %3 = vector.load %arg3[%c0_3, %c0_4] : memref<1x128xf32, #tpu.memory_space<vmem>>, vector<1x128xf32>
    %4 = vector.broadcast %3 : vector<1x128xf32> to vector<8x128xf32>
    %5 = arith.addf %2, %4 : vector<8x128xf32>
    %cst_5 = arith.constant 0.000000e+00 : f32
    %6 = vector.broadcast %cst_5 : f32 to vector<8x128xf32>
    %7 = arith.maximumf %5, %6 : vector<8x128xf32>
    %c0_6 = arith.constant 0 : index
    %c0_7 = arith.constant 0 : index
    %8 = vector.load %arg4[%c0_6, %c0_7] : memref<128x128xf32, #tpu.memory_space<vmem>>, vector<128x128xf32>
    %cst_8 = arith.constant dense<0.000000e+00> : vector<8x128xf32>
    %9 = tpu.matmul %7, %8, %cst_8 {dimension_numbers = #tpu.dot_dimension_numbers<[1], [0], [0], [1], [0, 0, 1, 1], [], []>} : vector<8x128xf32>, vector<128x128xf32>, vector<8x128xf32> -> vector<8x128xf32>
    %c0_9 = arith.constant 0 : index
    %c0_10 = arith.constant 0 : index
    %10 = vector.load %arg5[%c0_9, %c0_10] : memref<1x128xf32, #tpu.memory_space<vmem>>, vector<1x128xf32>
    %11 = vector.broadcast %10 : vector<1x128xf32> to vector<8x128xf32>
    %12 = arith.addf %9, %11 : vector<8x128xf32>
    %13 = tpu.iota {dimensions = array<i32: 1>} : vector<8x128xi32>
    %c5_i32 = arith.constant 5 : i32
    %14 = vector.broadcast %c5_i32 : i32 to vector<8x128xi32>
    %15 = arith.cmpi slt, %13, %14 : vector<8x128xi32>
    %cst_11 = arith.constant 0xFF800000 : f32
    %16 = vector.broadcast %cst_11 : f32 to vector<8x128xf32>
    %17 = arith.select %15, %12, %16 : vector<8x128xi1>, vector<8x128xf32>
    %cst_12 = arith.constant dense<0xFF800000> : vector<8xf32>
    %18 = vector.multi_reduction <maximumf>, %17, %cst_12 [1] : vector<8x128xf32> to vector<8xf32>
    %19 = vector.shape_cast %18 : vector<8xf32> to vector<8x1xf32>
    %20 = vector.broadcast %19 : vector<8x1xf32> to vector<8x128xf32>
    %21 = arith.subf %17, %20 : vector<8x128xf32>
    %22 = math.exp %21 : vector<8x128xf32>
    %cst_13 = arith.constant dense<0.000000e+00> : vector<8xf32>
    %23 = vector.multi_reduction <add>, %22, %cst_13 [1] : vector<8x128xf32> to vector<8xf32>
    %24 = vector.shape_cast %23 : vector<8xf32> to vector<8x1xf32>
    %25 = math.log %24 : vector<8x1xf32>
    %26 = arith.addf %19, %25 : vector<8x1xf32>
    %c0_14 = arith.constant 0 : index
    %c0_15 = arith.constant 0 : index
    %27 = vector.load %arg6[%c0_14, %c0_15] : memref<8x256xf32, #tpu.memory_space<vmem>>, vector<8x128xf32>
    tpu.vector_store %arg6[%c0_14, %c0_15], %12 {strides = array<i32>} : memref<8x256xf32, #tpu.memory_space<vmem>>, vector<8x128xf32>,
    %28 = vector.broadcast %26 : vector<8x1xf32> to vector<8x128xf32>
    %29 = arith.subf %17, %28 : vector<8x128xf32>
    %c0_16 = arith.constant 0 : index
    %c128 = arith.constant 128 : index
    %30 = vector.load %arg6[%c0_16, %c128] : memref<8x256xf32, #tpu.memory_space<vmem>>, vector<8x128xf32>
    tpu.vector_store %arg6[%c0_16, %c128], %29 {strides = array<i32>} : memref<8x256xf32, #tpu.memory_space<vmem>>, vector<8x128xf32>,
    return
  }
  func.func @transform_0(%arg0: i32) -> (i32, i32) {
    %c0_i32 = arith.constant 0 : i32
    %c0_i32_0 = arith.constant 0 : i32
    return %arg0, %c0_i32 : i32, i32
  }
  func.func @transform_1(%arg0: i32) -> (i32, i32) {
    %c0_i32 = arith.constant 0 : i32
    %c0_i32_0 = arith.constant 0 : i32
    %c0_i32_1 = arith.constant 0 : i32
    return %c0_i32, %c0_i32_0 : i32, i32
  }
  func.func @transform_2(%arg0: i32) -> (i32, i32) {
    %c0_i32 = arith.constant 0 : i32
    %c0_i32_0 = arith.constant 0 : i32
    %c0_i32_1 = arith.constant 0 : i32
    return %c0_i32, %c0_i32_0 : i32, i32
  }
  func.func @transform_3(%arg0: i32) -> (i32, i32) {
    %c0_i32 = arith.constant 0 : i32
    %c0_i32_0 = arith.constant 0 : i32
    %c0_i32_1 = arith.constant 0 : i32
    return %c0_i32, %c0_i32_0 : i32, i32
  }
  func.func @transform_4(%arg0: i32) -> (i32, i32) {
    %c0_i32 = arith.constant 0 : i32
    %c0_i32_0 = arith.constant 0 : i32
    %c0_i32_1 = arith.constant 0 : i32
    return %c0_i32, %c0_i32_0 : i32, i32
  }
  func.func @transform_5(%arg0: i32) -> (i32, i32) {
    %c0_i32 = arith.constant 0 : i32
    %c0_i32_0 = arith.constant 0 : i32
    return %arg0, %c0_i32 : i32, i32
  }
}

</mosaic_0001>

<bundles_post_ra>
// kernel: policy_forward.1
= control target key start
LH: loop header
LB: loop body
LE: loop exit
PB: predicated region body
PF: predicated region fallthrough
CT: control target
= control target key end

     0   :  { %10 = vsyncpa [#allocation3], 0  ;;  %s1179_s18 = smov [#allocation2]   ;;  %s1289_s0 = inlined_call_operand.vmem [shape: bf16[8,1024], index: 0, kind: input, shape index: {}]   ;;  %s1290_s1 = inlined_call_operand.hbm [shape: bf16[1024,128], index: 1, kind: input, shape index: {}]   ;;  %s1291_s2 = inlined_call_operand.vmem [shape: f32[1,128], index: 2, kind: input, shape index: {}, may-alias: {2,4}]   ;;  %s1292_s3 = inlined_call_operand.vmem [shape: f32[128,128], index: 3, kind: input, shape index: {}]   ;;  %s1293_s4 = inlined_call_operand.vmem [shape: f32[1,128], index: 4, kind: input, shape index: {}, may-alias: {2,4}]   ;;  %s1294_s5 = inlined_call_operand.vmem [shape: f32[8,256], index: 5, kind: output, shape index: {}]  }
   0x1   :  { %s18_s19 = sshll.u32 %s1179_s18, 4  ;;  %s19_s19 = int_to_ptr.vmem [resolvable:$true] %s18_s19 }
   0x2   :  { %s1165_s20 = scalar_lea.vmem %s19_s19, 8192  ;;  %p1170_p1 = scmp.lt.s32.totalorder %s19_s19, %s19_s19 }
   0x3   :  { %p1166_p0 = scmp.ne.s32.totalorder %s19_s19, %s1165_s20  ;;  %p1171_p2 = scmp.lt.s32.totalorder %s1165_s20, %s1165_s20 }
   0x5   :  { %p1172_p3 = por %p1171_p2, %p1170_p1 }
   0x7   :  { %p1173_p4 = pnand %p1172_p3, %p1166_p0 }
   0x9   :  { %1176 = shalt.err (!%p1173_p4)
}
   0xa   :  { %s1180_s21 = smov 64   ;;  %s1181_s22 = smov 4  }
   0xb   :  { %24 = dma.hbm_to_vmem [thread:$0]  %s1290_s1, 8192, %s19_s19, [#allocation3], %s1180_s21, %s1180_s21, %s1181_s22  }
   0xc   :  { %1177 = dma.done.wait [#allocation3], 8192  }
   0xd   :  { %1178 = vsyncadd [#allocation3], 4294959104  ;;  %v1081_v0 = vld [vmem:[#allocation2 + $0x78] sm:$0xff]   ;;  %v1085_v4 = vld [vmem:[#allocation2 + $0x70] sm:$0xff]   ;;  %vm1183_vm0 = vmmov 0  }
   0xe   :  { %v1082_v1 = vld [vmem:[#allocation2 + $0xf8] sm:$0xff]   ;;  %936 = vmatprep.subr.bf16.mxu0 %v1081_v0  ;;  %v1086_v5 = vld [vmem:[#allocation2 + $0xf0] sm:$0xff]   ;;  %v1089_v8 = vld [vmem:[#allocation2 + $0x68] sm:$0xff]  }
   0xf   :  { %v1083_v2 = vld [vmem:[#allocation2 + $0x38] sm:$0xff]   ;;  %958 = vmatprep.subr.bf16.mxu1 %v1082_v1  ;;  %v1087_v6 = vld [vmem:[#allocation2 + $0x30] sm:$0xff]   ;;  %v1090_v9 = vld [vmem:[#allocation2 + $0xe8] sm:$0xff]  }
  0x10   :  { %v1084_v3 = vld [vmem:[#allocation2 + $0xb8] sm:$0xff]   ;;  %937 = vmatpush3.bf16.msra.mxu0 %v1083_v2  ;;  %v1088_v7 = vld [vmem:[#allocation2 + $0xb0] sm:$0xff]   ;;  %v1091_v10 = vld [vmem:[#allocation2 + $0x28] sm:$0xff]  }
  0x11   :  { %959 = vmatpush3.bf16.msra.mxu1 %v1084_v3  ;;  %938 = vmatprep.subr.bf16.mxu0 %v1085_v4  ;;  %v1092_v11 = vld [vmem:[#allocation2 + $0xa8] sm:$0xff]   ;;  %v1093_v12 = vld [vmem:[#allocation2 + $0x60] sm:$0xff]   ;;  %v1097_v16 = vld [vmem:[#allocation2 + $0x58] sm:$0xff]  }
  0x12   :  { %960 = vmatprep.subr.bf16.mxu1 %v1086_v5  ;;  %v1094_v13 = vld [vmem:[#allocation2 + $0xe0] sm:$0xff]   ;;  %v1098_v17 = vld [vmem:[#allocation2 + $0xd8] sm:$0xff]   ;;  %v1101_v20 = vld [vmem:[#allocation2 + $0x50] sm:$0xff]  }
  0x13   :  { %v1095_v14 = vld [vmem:[#allocation2 + $0x20] sm:$0xff]   ;;  %v1099_v18 = vld [vmem:[#allocation2 + $0x18] sm:$0xff]   ;;  %v1102_v21 = vld [vmem:[#allocation2 + $0xd0] sm:$0xff]  }
  0x14   :  { %939 = vmatpush3.bf16.msra.mxu0 %v1087_v6  ;;  %v1096_v15 = vld [vmem:[#allocation2 + $0xa0] sm:$0xff]   ;;  %v1100_v19 = vld [vmem:[#allocation2 + $0x98] sm:$0xff]   ;;  %v1103_v22 = vld [vmem:[#allocation2 + $0x10] sm:$0xff]  }
  0x15   :  { %961 = vmatpush3.bf16.msra.mxu1 %v1088_v7  ;;  %940 = vmatprep.subr.bf16.mxu0 %v1089_v8  ;;  %v1104_v23 = vld [vmem:[#allocation2 + $0x90] sm:$0xff]   ;;  %v1105_v24 = vld [vmem:[#allocation2 + $0x48] sm:$0xff]   ;;  %v1109_v28 = vld [vmem:[#allocation2 + $0x40] sm:$0xff]  }
  0x16   :  { %962 = vmatprep.subr.bf16.mxu1 %v1090_v9  ;;  %v1106_v25 = vld [vmem:[#allocation2 + $0xc8] sm:$0xff]   ;;  %v1110_v29 = vld [vmem:[#allocation2 + $0xc0] sm:$0xff]   ;;  %v1117_v38 = vld [vmem:[#allocation2 + $0x178] sm:$0xff]  }
  0x17   :  { %v1107_v26 = vld [vmem:[#allocation2 + $0x8] sm:$0xff]   ;;  %v1111_v30 = vld [vmem:[#allocation2] sm:$0xff]   ;;  %v1118_v39 = vld [vmem:[#allocation2 + $0x1f8] sm:$0xff]  }
  0x18   :  { %941 = vmatpush3.bf16.msra.mxu0 %v1091_v10  ;;  %v1108_v27 = vld [vmem:[#allocation2 + $0x88] sm:$0xff]   ;;  %v1112_v31 = vld [vmem:[#allocation2 + $0x80] sm:$0xff]   ;;  %v1119_v40 = vld [vmem:[#allocation2 + $0x138] sm:$0xff]  }
  0x19   :  { %963 = vmatpush3.bf16.msra.mxu1 %v1092_v11  ;;  %942 = vmatprep.subr.bf16.mxu0 %v1093_v12  ;;  %v35_v32 = vld [vmem:[%s1289_s0] sm:$0xff]  ;;  %v36_v33 = vld [vmem:[%s1289_s0 + $0x8] sm:$0xff]  ;;  %v1120_v41 = vld [vmem:[#allocation2 + $0x1b8] sm:$0xff]  }
  0x1a   :  { %964 = vmatprep.subr.bf16.mxu1 %v1094_v13  ;;  %v863_v34 = vcombine.low %v35_v32, %v35_v32  ;;  %v864_v35 = vcombine.high %v35_v32, %v35_v32  ;;  %v865_v36 = vcombine.low %v36_v33, %v36_v33  ;;  %v866_v37 = vcombine.high %v36_v33, %v36_v33  ;;  %v1121_v42 = vld [vmem:[#allocation2 + $0x170] sm:$0xff]   ;;  %v1125_v46 = vld [vmem:[#allocation2 + $0x168] sm:$0xff]   ;;  %v1129_v50 = vld [vmem:[#allocation2 + $0x160] sm:$0xff]  }
  0x1b   :  { %v1122_v43 = vld [vmem:[#allocation2 + $0x1f0] sm:$0xff]   ;;  %v1126_v47 = vld [vmem:[#allocation2 + $0x1e8] sm:$0xff]   ;;  %v1130_v51 = vld [vmem:[#allocation2 + $0x1e0] sm:$0xff]   ;;  %v1182_v13 = vmov 0.0  }
  0x1c   :  { %943 = vmatpush3.bf16.msra.mxu0 %v1095_v14  ;;  %618 = vmatprep.mubr.bf16.mxu0 %v864_v35  ;;  %v1123_v44 = vld [vmem:[#allocation2 + $0x130] sm:$0xff]   ;;  %v1127_v48 = vld [vmem:[#allocation2 + $0x128] sm:$0xff]   ;;  %v1131_v52 = vld [vmem:[#allocation2 + $0x120] sm:$0xff]  }
  0x1d   :  { %965 = vmatpush3.bf16.msra.mxu1 %v1096_v15  ;;  %944 = vmatprep.subr.bf16.mxu0 %v1097_v16  ;;  %v1124_v45 = vld [vmem:[#allocation2 + $0x1b0] sm:$0xff]   ;;  %v1128_v49 = vld [vmem:[#allocation2 + $0x1a8] sm:$0xff]   ;;  %v1132_v53 = vld [vmem:[#allocation2 + $0x1a0] sm:$0xff]  }
  0x1e   :  { %966 = vmatprep.subr.bf16.mxu1 %v1098_v17  ;;  %658 = vmatprep.mubr.bf16.mxu1 %v866_v37  ;;  %v1133_v54 = vld [vmem:[#allocation2 + $0x158] sm:$0xff]   ;;  %v1137_v58 = vld [vmem:[#allocation2 + $0x150] sm:$0xff]   ;;  %v1141_v62 = vld [vmem:[#allocation2 + $0x148] sm:$0xff]  }
  0x1f   :  { %v1134_v55 = vld [vmem:[#allocation2 + $0x1d8] sm:$0xff]   ;;  %v1138_v59 = vld [vmem:[#allocation2 + $0x1d0] sm:$0xff]   ;;  %v1142_v63 = vld [vmem:[#allocation2 + $0x1c8] sm:$0xff]  }
  0x20   :  { %945 = vmatpush3.bf16.msra.mxu0 %v1099_v18  ;;  %v1135_v56 = vld [vmem:[#allocation2 + $0x118] sm:$0xff]   ;;  %v1139_v60 = vld [vmem:[#allocation2 + $0x110] sm:$0xff]   ;;  %v1143_v0 = vld [vmem:[#allocation2 + $0x108] sm:$0xff]  }
  0x21   :  { %967 = vmatpush3.bf16.msra.mxu1 %v1100_v19  ;;  %946 = vmatprep.subr.bf16.mxu0 %v1101_v20  ;;  %v1136_v57 = vld [vmem:[#allocation2 + $0x198] sm:$0xff]   ;;  %v1140_v61 = vld [vmem:[#allocation2 + $0x190] sm:$0xff]   ;;  %v1144_v1 = vld [vmem:[#allocation2 + $0x188] sm:$0xff]  }
  0x22   :  { %968 = vmatprep.subr.bf16.mxu1 %v1102_v21  ;;  %v1145_v2 = vld [vmem:[#allocation2 + $0x140] sm:$0xff]   ;;  %v37_v6 = vld [vmem:[%s1289_s0 + $0x10] sm:$0xff]  ;;  %v38_v9 = vld [vmem:[%s1289_s0 + $0x18] sm:$0xff] }
  0x23   :  { %v1146_v3 = vld [vmem:[#allocation2 + $0x1c0] sm:$0xff]   ;;  %v867_v7 = vcombine.low %v37_v6, %v37_v6  ;;  %v868_v8 = vcombine.high %v37_v6, %v37_v6  ;;  %v869_v10 = vcombine.low %v38_v9, %v38_v9  ;;  %v870_v11 = vcombine.high %v38_v9, %v38_v9  ;;  %v762_v12 = vld [vmem:[%s1292_s3 + $0x78] sm:$0xff]  ;;  %v761_v14 = vld [vmem:[%s1292_s3 + $0x70] sm:$0xff] }
  0x24   :  { %947 = vmatpush3.bf16.msra.mxu0 %v1103_v22  ;;  %v1147_v4 = vld [vmem:[#allocation2 + $0x100] sm:$0xff]   ;;  %v760_v15 = vld [vmem:[%s1292_s3 + $0x68] sm:$0xff]  ;;  %v758_v17 = vld [vmem:[%s1292_s3 + $0x58] sm:$0xff] }
  0x25   :  { %969 = vmatpush3.bf16.msra.mxu1 %v1104_v23  ;;  %948 = vmatprep.subr.bf16.mxu0 %v1105_v24  ;;  %v1148_v5 = vld [vmem:[#allocation2 + $0x180] sm:$0xff]   ;;  %v757_v18 = vld [vmem:[%s1292_s3 + $0x50] sm:$0xff]  ;;  %v756_v19 = vld [vmem:[%s1292_s3 + $0x48] sm:$0xff] }
  0x26   :  { %970 = vmatprep.subr.bf16.mxu1 %v1106_v25  ;;  %v759_v16 = vld [vmem:[%s1292_s3 + $0x60] sm:$0xff]  ;;  %v754_v21 = vld [vmem:[%s1292_s3 + $0x38] sm:$0xff]  ;;  %v753_v22 = vld [vmem:[%s1292_s3 + $0x30] sm:$0xff] }
  0x27   :  { %v755_v20 = vld [vmem:[%s1292_s3 + $0x40] sm:$0xff]  ;;  %v752_v23 = vld [vmem:[%s1292_s3 + $0x28] sm:$0xff]  ;;  %v750_v25 = vld [vmem:[%s1292_s3 + $0x18] sm:$0xff] }
  0x28   :  { %949 = vmatpush3.bf16.msra.mxu0 %v1107_v26  ;;  %v751_v24 = vld [vmem:[%s1292_s3 + $0x20] sm:$0xff]  ;;  %v749_v26 = vld [vmem:[%s1292_s3 + $0x10] sm:$0xff] }
  0x29   :  { %971 = vmatpush3.bf16.msra.mxu1 %v1108_v27  ;;  %950 = vmatprep.subr.bf16.mxu0 %v1109_v28  ;;  %v748_v27 = vld [vmem:[%s1292_s3 + $0x8] sm:$0xff]  ;;  %v747_v28 = vld [vmem:[%s1292_s3] sm:$0xff] }
  0x2a   :  { %972 = vmatprep.subr.bf16.mxu1 %v1110_v29 }
  0x2c   :  { %951 = vmatpush3.bf16.msra.mxu0 %v1111_v30 }
  0x2d   :  { %973 = vmatpush3.bf16.msra.mxu1 %v1112_v31  ;;  %980 = vmatprep.subr.bf16.mxu0 %v1117_v38  ;;  %v862_v38 = vld [vmem:[%s1291_s2] ss:$0 sm:$0xff] }
  0x2e   :  { %1002 = vmatprep.subr.bf16.mxu1 %v1118_v39 }
  0x2f   :  { %619 = vmatmul.mubr.bf16.vlgmr.msra.gmra.mxu0 %v863_v34 }
  0x30   :  { %659 = vmatmul.mubr.bf16.vlgmr.msra.gmra.mxu1 %v865_v36  ;;  %981 = vmatpush3.bf16.msra.mxu0 %v1119_v40 }
  0x31   :  { %1003 = vmatpush3.bf16.msra.mxu1 %v1120_v41  ;;  %982 = vmatprep.subr.bf16.mxu0 %v1121_v42 }
  0x32   :  { %1004 = vmatprep.subr.bf16.mxu1 %v1122_v43  ;;  %698 = vmatprep.mubr.bf16.mxu0 %v868_v8 }
  0x33   :  { %738 = vmatprep.mubr.bf16.mxu1 %v870_v11 }
  0x34   :  { %983 = vmatpush3.bf16.msra.mxu0 %v1123_v44 }
  0x35   :  { %1005 = vmatpush3.bf16.msra.mxu1 %v1124_v45  ;;  %984 = vmatprep.subr.bf16.mxu0 %v1125_v46 }
  0x36   :  { %1006 = vmatprep.subr.bf16.mxu1 %v1126_v47 }
  0x38   :  { %985 = vmatpush3.bf16.msra.mxu0 %v1127_v48 }
  0x39   :  { %1007 = vmatpush3.bf16.msra.mxu1 %v1128_v49  ;;  %986 = vmatprep.subr.bf16.mxu0 %v1129_v50 }
  0x3a   :  { %1008 = vmatprep.subr.bf16.mxu1 %v1130_v51 }
  0x3c   :  { %987 = vmatpush3.bf16.msra.mxu0 %v1131_v52 }
  0x3d   :  { %1009 = vmatpush3.bf16.msra.mxu1 %v1132_v53  ;;  %988 = vmatprep.subr.bf16.mxu0 %v1133_v54 }
  0x3e   :  { %1010 = vmatprep.subr.bf16.mxu1 %v1134_v55  ;;  %v840_v55 = vlaneseq }
  0x40   :  { %989 = vmatpush3.bf16.msra.mxu0 %v1135_v56  ;;  %v841_v56 = vand.u32 127, %v840_v55 }
  0x41   :  { %1011 = vmatpush3.bf16.msra.mxu1 %v1136_v57  ;;  %990 = vmatprep.subr.bf16.mxu0 %v1137_v58  ;;  %v935_v57 = vld [vmem:[%s1293_s4] ss:$0 sm:$0xff] }
  0x42   :  { %1012 = vmatprep.subr.bf16.mxu1 %v1138_v59  ;;  %vm842_vm1 = vcmp.lt.s32.totalorder %v841_v56, 5 }
  0x44   :  { %991 = vmatpush3.bf16.msra.mxu0 %v1139_v60 }
  0x45   :  { %1013 = vmatpush3.bf16.msra.mxu1 %v1140_v61  ;;  %992 = vmatprep.subr.bf16.mxu0 %v1141_v62 }
  0x46   :  { %1014 = vmatprep.subr.bf16.mxu1 %v1142_v63 }
  0x48   :  { %993 = vmatpush3.bf16.msra.mxu0 %v1143_v0 }
  0x49   :  { %1015 = vmatpush3.bf16.msra.mxu1 %v1144_v1  ;;  %994 = vmatprep.subr.bf16.mxu0 %v1145_v2 }
  0x4a   :  { %1016 = vmatprep.subr.bf16.mxu1 %v1146_v3 }
  0x4c   :  { %995 = vmatpush3.bf16.msra.mxu0 %v1147_v4 }
  0x4d   :  { %1017 = vmatpush3.bf16.msra.mxu1 %v1148_v5  ;;  %1041 = vmatprep.subr.mxu0 %v1182_v13 }
  0x4f   :  { %699 = vmatmul.mubr.bf16.vlgmr.msra.gmra.mxu0 %v867_v7 }
  0x50   :  { %739 = vmatmul.mubr.bf16.vlgmr.msra.gmra.mxu1 %v869_v10  ;;  %1042 = vmatpush3.msra.mxu0 %v762_v12 }
  0x51   :  { %1043 = vmatprep.subr.mxu0 %v1182_v13  ;;  %1073 = vmatprep.mubr.msk.f32.mxu0 %vm1183_vm0, %v1182_v13 }
  0x52   :  { %1044 = vmatpush3.msra.mxu0 %v761_v14 }
  0x53   :  { %1045 = vmatprep.subr.mxu0 %v1182_v13 }
  0x54   :  { %1046 = vmatpush3.msra.mxu0 %v760_v15 }
  0x55   :  { %1047 = vmatprep.subr.mxu0 %v1182_v13 }
  0x56   :  { %1048 = vmatpush3.msra.mxu0 %v759_v16 }
  0x57   :  { %1049 = vmatprep.subr.mxu0 %v1182_v13 }
  0x58   :  { %1050 = vmatpush3.msra.mxu0 %v758_v17 }
  0x59   :  { %1051 = vmatprep.subr.mxu0 %v1182_v13 }
  0x5a   :  { %1052 = vmatpush3.msra.mxu0 %v757_v18 }
  0x5b   :  { %1053 = vmatprep.subr.mxu0 %v1182_v13 }
  0x5c   :  { %1054 = vmatpush3.msra.mxu0 %v756_v19 }
  0x5d   :  { %1055 = vmatprep.subr.mxu0 %v1182_v13 }
  0x5e   :  { %1056 = vmatpush3.msra.mxu0 %v755_v20 }
  0x5f   :  { %1057 = vmatprep.subr.mxu0 %v1182_v13 }
  0x60   :  { %1058 = vmatpush3.msra.mxu0 %v754_v21 }
  0x61   :  { %1059 = vmatprep.subr.mxu0 %v1182_v13 }
  0x62   :  { %1060 = vmatpush3.msra.mxu0 %v753_v22 }
  0x63   :  { %1061 = vmatprep.subr.mxu0 %v1182_v13 }
  0x64   :  { %1062 = vmatpush3.msra.mxu0 %v752_v23 }
  0x65   :  { %1063 = vmatprep.subr.mxu0 %v1182_v13 }
  0x66   :  { %1064 = vmatpush3.msra.mxu0 %v751_v24 }
  0x67   :  { %1065 = vmatprep.subr.mxu0 %v1182_v13 }
  0x68   :  { %1066 = vmatpush3.msra.mxu0 %v750_v25 }
  0x69   :  { %1067 = vmatprep.subr.mxu0 %v1182_v13 }
  0x6a   :  { %1068 = vmatpush3.msra.mxu0 %v749_v26 }
  0x6b   :  { %1069 = vmatprep.subr.mxu0 %v1182_v13 }
  0x6c   :  { %1070 = vmatpush3.msra.mxu0 %v748_v27 }
  0x6d   :  { %1071 = vmatprep.subr.mxu0 %v1182_v13 }
  0x6e   :  { %1072 = vmatpush3.msra.mxu0 %v747_v28 }
  0xef   :  { %v952_v29 = vpop.f32.mrf.mxu0 }
  0xf0   :  { %v974_v30 = vpop.f32.mrf.mxu1 }
  0xf1   :  { %v953_v31 = vpop.f32.mrf.mxu0 }
  0xf2   :  { %v975_v32 = vpop.f32.mrf.mxu1  ;;  %v954_v37 = vadd.f32 %v953_v31, %v952_v29 }
  0xf3   :  { %v955_v33 = vpop.f32.mrf.mxu0  ;;  %v976_v40 = vadd.f32 %v975_v32, %v974_v30 }
  0xf4   :  { %v977_v34 = vpop.f32.mrf.mxu1  ;;  %v621_v39 = vadd.f32 %v954_v37, %v862_v38 }
  0xf5   :  { %v956_v35 = vpop.f32.mrf.mxu0 }
  0xf6   :  { %v978_v36 = vpop.f32.mrf.mxu1  ;;  %v661_v45 = vadd.f32 %v976_v40, %v621_v39 }
 0x10f   :  { %v996_v41 = vpop.f32.mrf.mxu0 }
 0x110   :  { %v1018_v42 = vpop.f32.mrf.mxu1 }
 0x111   :  { %v997_v43 = vpop.f32.mrf.mxu0 }
 0x112   :  { %v1019_v44 = vpop.f32.mrf.mxu1  ;;  %v998_v46 = vadd.f32 %v997_v43, %v996_v41 }
 0x113   :  { %v999_v47 = vpop.f32.mrf.mxu0  ;;  %v1020_v50 = vadd.f32 %v1019_v44, %v1018_v42 }
 0x114   :  { %v1021_v48 = vpop.f32.mrf.mxu1  ;;  %v701_v49 = vadd.f32 %v998_v46, %v661_v45 }
 0x115   :  { %v1000_v51 = vpop.f32.mrf.mxu0 }
 0x116   :  { %v1022_v52 = vpop.f32.mrf.mxu1  ;;  %v741_v53 = vadd.f32 %v1020_v50, %v701_v49 }
 0x118   :  { %v746_v54 = vmax.f32 %v741_v53, 0.0 }
 0x11a   :  { %1074 = vmatmul.mubr.f32.vlgmr.msra.gmra.mxu0 %v746_v54 }
 0x1da   :  { %v836_v58 = vpop.f32.mrf.mxu0 }
 0x1db   :  { %v837_v59 = vadd.f32 %v935_v57, %v836_v58 }
 0x1dc   :  { %v1075_v60 = vpop.f32.mrf.mxu0 }
 0x1dd   :  { %854 = vst [vmem:[%s1294_s5] sm:$0xff] %v837_v59  ;;  %v843_v61 = vsel %vm842_vm1, %v837_v59, -inf }
 0x1de   :  { %844 = vmax.xlane.f32.xlu0 %v843_v61 }
 0x267   :  { %v845_v62 = vpop.xlane.xlu0 %844 }
 0x268   :  { %v846_v63 = vsub.f32 %v843_v61, %v845_v62 }
 0x26a   :  { %v847_v0 = vmul.f32 1.442695, %v846_v63 }
 0x26c   :  { %1153 = vpow2.f32 %v847_v0 }
 0x279   :  { %v1154_v1 = vpop.eup %1153 }
 0x27a   :  { %849 = vadd.xlane.f32.xlu0 %v1154_v1 }
 0x303   :  { %v850_v2 = vpop.xlane.xlu0 %849 }
 0x304   :  { %1155 = vlog2.f32 %v850_v2 }
 0x311   :  { %v1156_v3 = vpop.eup %1155 }
 0x312   :  { %v852_v4 = vmul.f32 0.6931472, %v1156_v3 }
 0x314   :  { %v853_v5 = vadd.f32 %v852_v4, %v845_v62 }
 0x316   :  { %v855_v6 = vsub.f32 %v843_v61, %v853_v5 }
 0x318   :  { %856 = vst [vmem:[%s1294_s5 + $0x8] sm:$0xff] %v855_v6 }
 0x319   :  { %861 = vsyncpa [#allocation3], 1 }

</bundles_post_ra>
